<compile_context>
chip_gen: v6e
topology: v6e:2x2x1
jax: 0.10.0
libtpu: 0.0.40
codegen_flags: <defaults>
</compile_context>

<pallas_src>
import functools

import jax
import jax.numpy as jnp
from jax.experimental import pallas as pl
from jax.experimental.pallas import tpu as pltpu  # noqa: F401  (kept for TPU-specific tuning hooks)


def _fused_mlp_kernel(*refs, n_layers: int):
    # refs = (x_ref, w0_ref, b0_ref, w1_ref, b1_ref, ..., w_{L-1}_ref, b_{L-1}_ref, o_ref)
    x_ref = refs[0]
    o_ref = refs[-1]
    param_refs = refs[1:-1]

    x = x_ref[...]
    for i in range(n_layers):
        w = param_refs[2 * i][...]        # [IN_i, OUT_i]
        b = param_refs[2 * i + 1][...]    # [1, OUT_i]
        y = jnp.dot(x, w, preferred_element_type=jnp.float32) + b
        if i < n_layers - 1:
            y = jnp.maximum(y, 0.0)       # hidden layers: ReLU (dropout = identity at eval)
        x = y
    o_ref[...] = x.astype(o_ref.dtype)


def basic_ann_forward(x, params):
    """Fused forward pass: one pallas_call for the whole MLP.

    params: list of (w, b) with w: [in, out] and b: [1, out].
    """
    B, _ = x.shape
    n_layers = len(params)
    OUT = params[-1][0].shape[1]

    in_specs = [pl.BlockSpec(x.shape, lambda: (0, 0))]
    flat_params = []
    flops = 0
    bytes_accessed = x.size * x.dtype.itemsize
    for (w, b) in params:
        in_specs.append(pl.BlockSpec(w.shape, lambda: (0, 0)))
        in_specs.append(pl.BlockSpec(b.shape, lambda: (0, 0)))
        flat_params.extend([w, b])
        flops += 2 * B * w.shape[0] * w.shape[1]
        bytes_accessed += w.size * w.dtype.itemsize + b.size * b.dtype.itemsize
    bytes_accessed += B * OUT * x.dtype.itemsize

    kernel = functools.partial(_fused_mlp_kernel, n_layers=n_layers)
    return pl.pallas_call(
        kernel,
        out_shape=jax.ShapeDtypeStruct((B, OUT), x.dtype),
        in_specs=in_specs,
        out_specs=pl.BlockSpec((B, OUT), lambda: (0, 0)),
        # Advisory hint so a surrounding jit schedules around this tiny kernel correctly.
        cost_estimate=pl.CostEstimate(
            flops=flops, transcendentals=0, bytes_accessed=bytes_accessed
        ),
    )(x, *flat_params)


def init_basic_ann_params(key, num_x_var, num_cat, hidden_sizes):
    """Deterministic parameter init mimicking nn.Linear's U(-1/sqrt(fan_in), 1/sqrt(fan_in)).
    Weights stored as [in_features, out_features]; biases as [1, out_features]."""
    params = []
    in_size = num_x_var
    sizes = list(hidden_sizes) + [num_cat]
    for out_size in sizes:
        key, kw, kb = jax.random.split(key, 3)
        bound = 1.0 / jnp.sqrt(jnp.float32(in_size))
        w = jax.random.uniform(kw, (in_size, out_size), jnp.float32, -bound, bound)
        b = jax.random.uniform(kb, (1, out_size), jnp.float32, -bound, bound)
        params.append((w, b))
        in_size = out_size
    return params


def basic_ann_reference(x, params):
    """Plain-JAX reference for verification."""
    n_layers = len(params)
    for i, (w, b) in enumerate(params):
        y = x @ w + b
        x = y if i == n_layers - 1 else jnp.maximum(y, 0.0)
    return x


if __name__ == "__main__":
    # Small shapes consistent with the module: batch=8, num_x_var=32,
    # hidden_sizes=[64, 32], num_cat=4, dropout_prob=0.1 (identity at inference).
    key = jax.random.PRNGKey(0)
    key, kx = jax.random.split(key)

    batch = 8
    num_x_var = 32
    hidden_sizes = [64, 32]
    num_cat = 4

    x = jax.random.normal(kx, (batch, num_x_var), dtype=jnp.float32)
    params = init_basic_ann_params(key, num_x_var, num_cat, hidden_sizes)

    out = basic_ann_forward(x, params)
    out = jax.block_until_ready(out)

    ref = basic_ann_reference(x, params)
    assert out.shape == (batch, num_cat), out.shape
    assert jnp.allclose(out, ref, atol=1e-5, rtol=1e-5), "mismatch vs reference"

    print("KERNEL_OK")
</pallas_src>

<mosaic_0001>
module attributes {stable_mosaic.version = 11 : i64} {
  func.func @_fused_mlp_kernel(%arg0: memref<8x32xf32, #tpu.memory_space<vmem>>, %arg1: memref<32x64xf32, #tpu.memory_space<vmem>>, %arg2: memref<1x64xf32, #tpu.memory_space<vmem>>, %arg3: memref<64x32xf32, #tpu.memory_space<vmem>>, %arg4: memref<1x32xf32, #tpu.memory_space<vmem>>, %arg5: memref<32x4xf32, #tpu.memory_space<vmem>>, %arg6: memref<1x4xf32, #tpu.memory_space<vmem>>, %arg7: memref<8x4xf32, #tpu.memory_space<vmem>>) attributes {dimension_semantics = [], scalar_prefetch = 0 : i64, scratch_operands = 0 : i64, tpu.core_type = #tpu.core_type<tc>} {
    %c0 = arith.constant 0 : index
    %c0_0 = arith.constant 0 : index
    %0 = vector.load %arg0[%c0, %c0_0] : memref<8x32xf32, #tpu.memory_space<vmem>>, vector<8x32xf32>
    %c0_1 = arith.constant 0 : index
    %c0_2 = arith.constant 0 : index
    %1 = vector.load %arg1[%c0_1, %c0_2] : memref<32x64xf32, #tpu.memory_space<vmem>>, vector<32x64xf32>
    %c0_3 = arith.constant 0 : index
    %c0_4 = arith.constant 0 : index
    %2 = vector.load %arg2[%c0_3, %c0_4] : memref<1x64xf32, #tpu.memory_space<vmem>>, vector<1x64xf32>
    %cst = arith.constant dense<0.000000e+00> : vector<8x64xf32>
    %3 = tpu.matmul %0, %1, %cst {dimension_numbers = #tpu.dot_dimension_numbers<[1], [0], [0], [1], [0, 0, 1, 1], [], []>} : vector<8x32xf32>, vector<32x64xf32>, vector<8x64xf32> -> vector<8x64xf32>
    %4 = vector.broadcast %2 : vector<1x64xf32> to vector<8x64xf32>
    %5 = arith.addf %3, %4 : vector<8x64xf32>
    %cst_5 = arith.constant 0.000000e+00 : f32
    %6 = vector.broadcast %cst_5 : f32 to vector<8x64xf32>
    %7 = arith.maximumf %5, %6 : vector<8x64xf32>
    %c0_6 = arith.constant 0 : index
    %c0_7 = arith.constant 0 : index
    %8 = vector.load %arg3[%c0_6, %c0_7] : memref<64x32xf32, #tpu.memory_space<vmem>>, vector<64x32xf32>
    %c0_8 = arith.constant 0 : index
    %c0_9 = arith.constant 0 : index
    %9 = vector.load %arg4[%c0_8, %c0_9] : memref<1x32xf32, #tpu.memory_space<vmem>>, vector<1x32xf32>
    %cst_10 = arith.constant dense<0.000000e+00> : vector<8x32xf32>
    %10 = tpu.matmul %7, %8, %cst_10 {dimension_numbers = #tpu.dot_dimension_numbers<[1], [0], [0], [1], [0, 0, 1, 1], [], []>} : vector<8x64xf32>, vector<64x32xf32>, vector<8x32xf32> -> vector<8x32xf32>
    %11 = vector.broadcast %9 : vector<1x32xf32> to vector<8x32xf32>
    %12 = arith.addf %10, %11 : vector<8x32xf32>
    %cst_11 = arith.constant 0.000000e+00 : f32
    %13 = vector.broadcast %cst_11 : f32 to vector<8x32xf32>
    %14 = arith.maximumf %12, %13 : vector<8x32xf32>
    %c0_12 = arith.constant 0 : index
    %c0_13 = arith.constant 0 : index
    %15 = vector.load %arg5[%c0_12, %c0_13] : memref<32x4xf32, #tpu.memory_space<vmem>>, vector<32x4xf32>
    %c0_14 = arith.constant 0 : index
    %c0_15 = arith.constant 0 : index
    %16 = vector.load %arg6[%c0_14, %c0_15] : memref<1x4xf32, #tpu.memory_space<vmem>>, vector<1x4xf32>
    %cst_16 = arith.constant dense<0.000000e+00> : vector<8x4xf32>
    %17 = tpu.matmul %14, %15, %cst_16 {dimension_numbers = #tpu.dot_dimension_numbers<[1], [0], [0], [1], [0, 0, 1, 1], [], []>} : vector<8x32xf32>, vector<32x4xf32>, vector<8x4xf32> -> vector<8x4xf32>
    %18 = vector.broadcast %16 : vector<1x4xf32> to vector<8x4xf32>
    %19 = arith.addf %17, %18 : vector<8x4xf32>
    %c0_17 = arith.constant 0 : index
    %c0_18 = arith.constant 0 : index
    %20 = vector.load %arg7[%c0_17, %c0_18] : memref<8x4xf32, #tpu.memory_space<vmem>>, vector<8x4xf32>
    tpu.vector_store %arg7[%c0_17, %c0_18], %19 {strides = array<i32>} : memref<8x4xf32, #tpu.memory_space<vmem>>, vector<8x4xf32>,
    return
  }
}

</mosaic_0001>

<bundles_post_ra>
// kernel: tpu_custom_call.1
= control target key start
LH: loop header
LB: loop body
LE: loop exit
PB: predicated region body
PF: predicated region fallthrough
CT: control target
= control target key end

     0   :  { %v361_v0 = vmov 0.0   ;;  %vm362_vm0 = vmmov 0   ;;  %vm38_vm1 = vcmask 261120   ;;  %vm128_vm2 = vcmask 523264   ;;  %s471_s1 = inlined_call_operand.vmem [shape: f32[32,64], index: 1, kind: input, shape index: {}]   ;;  %s472_s3 = inlined_call_operand.vmem [shape: f32[64,32], index: 3, kind: input, shape index: {}]   ;;  %s473_s0 = inlined_call_operand.vmem [shape: f32[8,32], index: 0, kind: input, shape index: {}]   ;;  %s474_s5 = inlined_call_operand.vmem [shape: f32[32,4], index: 5, kind: input, shape index: {}]   ;;  %s475_s2 = inlined_call_operand.vmem [shape: f32[1,64], index: 2, kind: input, shape index: {}]   ;;  %s476_s4 = inlined_call_operand.vmem [shape: f32[1,32], index: 4, kind: input, shape index: {}]   ;;  %s477_s6 = inlined_call_operand.vmem [shape: f32[1,4], index: 6, kind: input, shape index: {}]   ;;  %s478_s7 = inlined_call_operand.vmem [shape: f32[8,4], index: 7, kind: output, shape index: {}]  }
   0x1   :  { %318 = vmatprep.subr.mxu0 %v361_v0  ;;  %v30_v1 = vld [vmem:[%s471_s1 + $0x18] sm:$0xff]  ;;  %v29_v2 = vld [vmem:[%s471_s1 + $0x10] sm:$0xff]  ;;  %326 = vmatprep.mubr.msk.f32.mxu0 %vm362_vm0, %v361_v0  ;;  %v28_v4 = vld [vmem:[%s471_s1 + $0x8] sm:$0xff]  ;;  %vm287_vm3 = vcmask 31744  }
   0x2   :  { %319 = vmatpush3.msra.mxu0 %v30_v1  ;;  %329 = vmatprep.subr.mxu1 %v361_v0  ;;  %v120_v3 = vld [vmem:[%s472_s3 + $0x38] sm:$0xff]  ;;  %v119_v5 = vld [vmem:[%s472_s3 + $0x30] sm:$0xff]  ;;  %v118_v6 = vld [vmem:[%s472_s3 + $0x28] sm:$0xff] }
   0x3   :  { %320 = vmatprep.subr.mxu0 %v361_v0  ;;  %330 = vmatpush3.msra.mxu1 %v120_v3  ;;  %v27_v7 = vld [vmem:[%s471_s1] sm:$0xff]  ;;  %v116_v10 = vld [vmem:[%s472_s3 + $0x18] sm:$0xff]  ;;  %v115_v11 = vld [vmem:[%s472_s3 + $0x10] sm:$0xff] }
   0x4   :  { %321 = vmatpush3.msra.mxu0 %v29_v2  ;;  %331 = vmatprep.subr.mxu1 %v361_v0  ;;  %v26_v8 = vld [vmem:[%s473_s0] sm:$0xff]  ;;  %v114_v12 = vld [vmem:[%s472_s3 + $0x8] sm:$0xff]  ;;  %v206_v14 = vld [vmem:[%s474_s5 + $0x18] sm:$0xff] }
   0x5   :  { %322 = vmatprep.subr.mxu0 %v361_v0  ;;  %332 = vmatpush3.msra.mxu1 %v119_v5  ;;  %v117_v9 = vld [vmem:[%s472_s3 + $0x20] sm:$0xff]  ;;  %v205_v20 = vld [vmem:[%s474_s5 + $0x10] sm:$0xff]  ;;  %v204_v21 = vld [vmem:[%s474_s5 + $0x8] sm:$0xff] }
   0x6   :  { %323 = vmatpush3.msra.mxu0 %v28_v4  ;;  %333 = vmatprep.subr.mxu1 %v361_v0  ;;  %v113_v13 = vld [vmem:[%s472_s3] sm:$0xff] }
   0x7   :  { %324 = vmatprep.subr.mxu0 %v361_v0  ;;  %334 = vmatpush3.msra.mxu1 %v118_v6  ;;  %v293_v15 = vld [vmem:[%s475_s2] ss:$0 sm:$0xff] }
   0x8   :  { %325 = vmatpush3.msra.mxu0 %v27_v7  ;;  %335 = vmatprep.subr.mxu1 %v361_v0  ;;  %v203_v22 = vld [vmem:[%s474_s5] sm:$0xff] }
   0x9   :  { %327 = vmatmul.mubr.msk.f32.vlgmr.msra.gmra.mxu0 %vm38_vm1, %v26_v8  ;;  %336 = vmatpush3.msra.mxu1 %v117_v9  ;;  %v295_v23 = vld [vmem:[%s476_s4] ss:$0 sm:$0xff] }
   0xa   :  { %337 = vmatprep.subr.mxu1 %v361_v0  ;;  %345 = vmatprep.mubr.msk.f32.mxu1 %vm362_vm0, %v361_v0  ;;  %v297_v28 = vld [vmem:[%s477_s6] ss:$0 sm:$0xff] }
   0xb   :  { %338 = vmatpush3.msra.mxu1 %v116_v10  ;;  %348 = vmatprep.subr.mxu0 %v361_v0 }
   0xc   :  { %339 = vmatprep.subr.mxu1 %v361_v0  ;;  %356 = vmatprep.mubr.msk.f32.mxu0 %vm362_vm0, %v361_v0 }
   0xd   :  { %340 = vmatpush3.msra.mxu1 %v115_v11  ;;  %349 = vmatpush3.msra.mxu0 %v206_v14 }
   0xe   :  { %341 = vmatprep.subr.mxu1 %v361_v0  ;;  %350 = vmatprep.subr.mxu0 %v361_v0 }
   0xf   :  { %342 = vmatpush3.msra.mxu1 %v114_v12  ;;  %351 = vmatpush3.msra.mxu0 %v205_v20 }
  0x10   :  { %343 = vmatprep.subr.mxu1 %v361_v0  ;;  %352 = vmatprep.subr.mxu0 %v361_v0 }
  0x11   :  { %344 = vmatpush3.msra.mxu1 %v113_v13  ;;  %353 = vmatpush3.msra.mxu0 %v204_v21 }
  0x12   :  { %354 = vmatprep.subr.mxu0 %v361_v0 }
  0x13   :  { %355 = vmatpush3.msra.mxu0 %v203_v22 }
  0xc9   :  { %v108_v16 = vpop.f32.mrf.mxu0 }
  0xca   :  { %v109_v17 = vadd.f32 %v293_v15, %v108_v16 }
  0xcb   :  { %v328_v18 = vpop.f32.mrf.mxu0 }
  0xcc   :  { %v112_v19 = vmax.f32 %v109_v17, 0.0 }
  0xce   :  { %346 = vmatmul.mubr.msk.f32.vlgmr.msra.gmra.mxu1 %vm128_vm2, %v112_v19 }
 0x18e   :  { %v198_v24 = vpop.f32.mrf.mxu1 }
 0x18f   :  { %v199_v25 = vadd.f32 %v295_v23, %v198_v24 }
 0x190   :  { %v347_v26 = vpop.f32.mrf.mxu1 }
 0x191   :  { %v202_v27 = vmax.f32 %v199_v25, 0.0 }
 0x193   :  { %357 = vmatmul.mubr.msk.f32.vlgmr.msra.gmra.mxu0 %vm38_vm1, %v202_v27 }
 0x253   :  { %v283_v29 = vpop.f32.mrf.mxu0 }
 0x254   :  { %v284_v30 = vadd.f32 %v297_v28, %v283_v29 }
 0x255   :  { %v358_v31 = vpop.f32.mrf.mxu0 }
 0x256   :  { %288 = vst.msk [vmem:[%s478_s7] sm:$0xff] %vm287_vm3, %v284_v30 }

</bundles_post_ra>
